<compile_context>
chip_gen: v5e
topology: v5e:2x2
jax: 0.10.0
libtpu: 0.0.40
codegen_flags: <defaults>
</compile_context>

<pallas_src>
import numpy as np
import jax
import jax.numpy as jnp
from jax.experimental import pallas as pl
from jax.experimental.pallas import tpu as pltpu


def _round_up(x, m):
    return ((x + m - 1) // m) * m


# ---------------------------------------------------------------------------
# Kernel: one grid step processes an (nb, Din) tile of input rows.
# Weights arrive pre-masked, pre-transposed (in, out) and hidden-padded.
# ---------------------------------------------------------------------------
def _skeleton_encoder_kernel(x_ref,
                             w1_ref, b1_ref,
                             w2_ref, b2_ref,
                             w3_ref, b3_ref,
                             out_ref):
    cdt = w1_ref.dtype                      # MXU operand dtype (f32 or bf16)
    h = jnp.dot(x_ref[...].astype(cdt), w1_ref[...],
                preferred_element_type=jnp.float32) + b1_ref[...]
    h = jnp.where(h >= 0.0, h, 0.2 * h)     # LeakyReLU(negative_slope=0.2)
    h = jnp.dot(h.astype(cdt), w2_ref[...],
                preferred_element_type=jnp.float32) + b2_ref[...]
    h = jnp.where(h >= 0.0, h, 0.2 * h)
    h = jnp.dot(h.astype(cdt), w3_ref[...],
                preferred_element_type=jnp.float32) + b3_ref[...]
    h = jnp.where(h >= 0.0, h, 0.2 * h)
    out_ref[...] = h.astype(out_ref.dtype)


# ---------------------------------------------------------------------------
# One-time parameter preparation (hoisted out of the per-call path).
# ---------------------------------------------------------------------------
def prepare_skeleton_encoder_params(params, *, compute_dtype=jnp.float32):
    """Fold masks into weights once (PyTorch recomputes weight*mask per call),
    pre-transpose to (in, out), and zero-pad the hidden width up to a multiple
    of 128 lanes.  Mathematically exact (see header comment)."""
    w1 = (params["w1"] * params["m1"]).T.astype(jnp.float32)   # (Din, Dh)
    w2 = (params["w2"] * params["m2"]).T.astype(jnp.float32)   # (Dh, Dh)
    w3 = (params["w3"] * params["m3"]).T.astype(jnp.float32)   # (Dh, Dout)
    b1 = params["b1"].reshape(1, -1).astype(jnp.float32)
    b2 = params["b2"].reshape(1, -1).astype(jnp.float32)
    b3 = params["b3"].reshape(1, -1).astype(jnp.float32)

    dh = w1.shape[1]
    dhp = _round_up(dh, 128)                                   # 192 -> 256
    if dhp != dh:
        pad = dhp - dh
        w1 = jnp.pad(w1, ((0, 0), (0, pad)))
        w2 = jnp.pad(w2, ((0, pad), (0, pad)))
        w3 = jnp.pad(w3, ((0, pad), (0, 0)))
        b1 = jnp.pad(b1, ((0, 0), (0, pad)))
        b2 = jnp.pad(b2, ((0, 0), (0, pad)))

    return {
        "w1": w1.astype(compute_dtype), "b1": b1,
        "w2": w2.astype(compute_dtype), "b2": b2,
        "w3": w3.astype(compute_dtype), "b3": b3,
    }


# ---------------------------------------------------------------------------
# Wrapper.
# ---------------------------------------------------------------------------
def skeleton_encoder(offsets, prepared, *, block_rows=None, num_cores=1,
                     is_lafan1=True):
    """offsets: (B, input_dim) f32 (lafan1) or (B, njoints, 3) otherwise.
    prepared: output of prepare_skeleton_encoder_params.
    num_cores: 2 on v7x (two TensorCores) to split the batch evenly; 1 on
    v5e/v6e.  Returns (B, Dout) f32 (lafan1) or (B, Dout, 1) otherwise."""
    if not is_lafan1:
        offsets = offsets.reshape(offsets.shape[0], -1)
    x = offsets
    if x.dtype != jnp.float32:
        x = x.astype(jnp.float32)
    B, Din = x.shape

    w1, b1 = prepared["w1"], prepared["b1"]
    w2, b2 = prepared["w2"], prepared["b2"]
    w3, b3 = prepared["w3"], prepared["b3"]
    Dhp = w1.shape[1]
    Dout = w3.shape[1]
    assert w1.shape[0] == Din

    # Row-tile sizing: single block for small/moderate B (1-TC chips), even
    # split for num_cores=2 (v7x), <=512-row tiles for big batches.
    if block_rows is None:
        block_rows = min(pl.cdiv(B, num_cores), 512)
    nb = min(_round_up(block_rows, 8), _round_up(B, 8))
    grid = (pl.cdiv(B, nb),)

    flops = 2 * B * (Din * Dhp + Dhp * Dhp + Dhp * Dout)
    wbytes = sum(int(a.size) * a.dtype.itemsize
                 for a in (w1, b1, w2, b2, w3, b3))
    bytes_accessed = int(x.size) * x.dtype.itemsize + B * Dout * 4 + wbytes

    out = pl.pallas_call(
        _skeleton_encoder_kernel,
        out_shape=jax.ShapeDtypeStruct((B, Dout), jnp.float32),
        grid=grid,
        in_specs=[
            pl.BlockSpec((nb, Din), lambda n: (n, 0)),     # input rows
            pl.BlockSpec((Din, Dhp), lambda n: (0, 0)),    # w1 (masked, pre-T)
            pl.BlockSpec((1, Dhp), lambda n: (0, 0)),      # b1
            pl.BlockSpec((Dhp, Dhp), lambda n: (0, 0)),    # w2
            pl.BlockSpec((1, Dhp), lambda n: (0, 0)),      # b2
            pl.BlockSpec((Dhp, Dout), lambda n: (0, 0)),   # w3
            pl.BlockSpec((1, Dout), lambda n: (0, 0)),     # b3
        ],
        out_specs=pl.BlockSpec((nb, Dout), lambda n: (n, 0)),
        compiler_params=pltpu.CompilerParams(
            dimension_semantics=("parallel",)),
        cost_estimate=pl.CostEstimate(
            flops=flops, transcendentals=0, bytes_accessed=bytes_accessed),
    )(x, w1, b1, w2, b2, w3, b3)

    if not is_lafan1:
        out = out[..., None]
    return out


# ---------------------------------------------------------------------------
# Mask construction (mirrors get_offset_part_matrix + BodyPartMlp.__init__).
# ---------------------------------------------------------------------------
def get_offset_part_matrix(correspondence, num_offsets):
    nparts = len(correspondence)
    m = np.zeros((nparts, num_offsets), np.float32)
    for i, part in enumerate(correspondence):
        for j in part:
            m[i, j] = 1.0
    return m


def build_bodypart_mask(body_lens, masks, in_channels, out_channels, joint_num,
                        first_layer=False, last_layer=False):
    """Numpy mirror of BodyPartMlp.__init__'s mask construction."""
    in_per = in_channels // body_lens
    out_per = out_channels // body_lens
    if first_layer:
        per_joint = in_channels // joint_num
        in_neigh = []
        for i in range(masks.shape[0]):
            idx = np.where(masks[i] == 1)[0]
            in_neigh.append([int(k) * per_joint + j
                             for k in idx for j in range(per_joint)])
    else:
        in_neigh = [list(range(i * in_per, (i + 1) * in_per))
                    for i in range(body_lens)]
    if last_layer:
        per_joint = out_channels // joint_num
        out_neigh = []
        for i in range(body_lens):
            idx = np.where(masks[i] == 1)[0]
            out_neigh.append([int(k) * per_joint + j
                              for k in idx for j in range(per_joint)])
    else:
        out_neigh = [list(range(i * out_per, (i + 1) * out_per))
                     for i in range(body_lens)]
    mask = np.zeros((out_channels, in_channels), np.float32)
    for i in range(body_lens):
        for j in out_neigh[i]:
            mask[j, in_neigh[i]] = 1.0
    if last_layer:
        covered = set()
        for lst in out_neigh:
            covered.update(lst)
        for k in range(out_channels):
            if k not in covered:
                mask[k, :] = 1.0
    return mask


# TODO(synk): the non-lafan1 branch's mask builders (getbodyparts/calselfmask)
# are not part of the provided spec; that branch's forward is the same three
# masked linears + LeakyReLU with a wrapper-side reshape/unsqueeze, so the
# kernel above is reusable unchanged once those masks are supplied.


# ---------------------------------------------------------------------------
# Pure-JAX reference mirroring the PyTorch forward (lafan1, eval mode).
# ---------------------------------------------------------------------------
def _reference(offsets, params):
    x = offsets.astype(jnp.float32)
    for i in (1, 2, 3):
        w = params[f"w{i}"] * params[f"m{i}"]
        x = jnp.dot(x, w.T, precision=jax.lax.Precision.HIGHEST) + params[f"b{i}"]
        x = jnp.where(x >= 0.0, x, 0.2 * x)
    return x


if __name__ == "__main__":
    # Small, deterministic lafan1-style config.
    njoints = 9
    num_offsets = njoints - 1                 # 8 offsets
    correspondence = [[0, 1, 2], [3, 4], [5, 6, 7]]
    nparts = len(correspondence)              # 3 body parts
    dim_per_part = 64
    input_dim = num_offsets * 3               # 24
    output_dim = nparts * dim_per_part        # 192

    offset_part = get_offset_part_matrix(correspondence, num_offsets)
    m1 = build_bodypart_mask(nparts, offset_part, input_dim, output_dim,
                             num_offsets, first_layer=True)
    m2 = build_bodypart_mask(nparts, offset_part, output_dim, output_dim,
                             num_offsets)
    m3 = build_bodypart_mask(nparts, offset_part, output_dim, output_dim,
                             num_offsets)

    key = jax.random.PRNGKey(0)
    ks = jax.random.split(key, 8)

    def nrm(k, shape, scale=0.1):
        return (scale * jax.random.normal(k, shape)).astype(jnp.float32)

    params = {
        "w1": nrm(ks[0], (output_dim, input_dim)),
        "b1": nrm(ks[1], (output_dim,)),
        "w2": nrm(ks[2], (output_dim, output_dim)),
        "b2": nrm(ks[3], (output_dim,)),
        "w3": nrm(ks[4], (output_dim, output_dim)),
        "b3": nrm(ks[5], (output_dim,)),
        "m1": jnp.asarray(m1), "m2": jnp.asarray(m2), "m3": jnp.asarray(m3),
    }

    # Mask fold / transpose / hidden padding done ONCE, outside the call path.
    prepared_f32 = prepare_skeleton_encoder_params(params)

    # Case 1: B=64, default sizing -> grid=(1,) (right choice on v5e/v6e).
    offsets = nrm(ks[6], (64, input_dim), scale=1.0)
    out = jax.block_until_ready(
        skeleton_encoder(offsets, prepared_f32, is_lafan1=True))
    ref = _reference(offsets, params)
    assert out.shape == (64, output_dim)
    assert jnp.allclose(out, ref, atol=5e-3, rtol=5e-3)

    # Case 2: ragged batch + multi-step grid, no wrapper pad/slice
    # (B=37 with 16-row blocks -> grid=(3,), last block only 5 valid rows).
    offsets2 = nrm(ks[7], (37, input_dim), scale=1.0)
    out2 = jax.block_until_ready(
        skeleton_encoder(offsets2, prepared_f32, block_rows=16, is_lafan1=True))
    ref2 = _reference(offsets2, params)
    assert out2.shape == (37, output_dim)
    assert jnp.allclose(out2, ref2, atol=5e-3, rtol=5e-3)

    # Case 3: bf16 MXU operands (large-batch option), f32 accumulate/bias/act.
    prepared_bf16 = prepare_skeleton_encoder_params(
        params, compute_dtype=jnp.bfloat16)
    out3 = jax.block_until_ready(
        skeleton_encoder(offsets, prepared_bf16, is_lafan1=True))
    assert out3.shape == (64, output_dim)
    assert jnp.allclose(out3, ref, atol=5e-2, rtol=5e-2)

    print("KERNEL_OK")
</pallas_src>

<mosaic_0001>
module attributes {stable_mosaic.version = 11 : i64} {
  func.func @_skeleton_encoder_kernel(%arg0: i32, %arg1: memref<64x24xf32, #tpu.memory_space<vmem>>, %arg2: memref<24x256xf32, #tpu.memory_space<vmem>>, %arg3: memref<1x256xf32, #tpu.memory_space<vmem>>, %arg4: memref<256x256xf32, #tpu.memory_space<vmem>>, %arg5: memref<1x256xf32, #tpu.memory_space<vmem>>, %arg6: memref<256x192xf32, #tpu.memory_space<vmem>>, %arg7: memref<1x192xf32, #tpu.memory_space<vmem>>, %arg8: memref<64x192xf32, #tpu.memory_space<vmem>>) attributes {dimension_semantics = [#tpu.dimension_semantics<parallel>], iteration_bounds = array<i64: 1>, scalar_prefetch = 0 : i64, scratch_operands = 0 : i64, tpu.core_type = #tpu.core_type<tc>, window_params = [{transform_indices = @transform_0, window_bounds = array<i64: 64, 24>}, {pipeline_mode = #tpu.pipeline_mode<synchronous>, transform_indices = @transform_1, window_bounds = array<i64: 24, 256>}, {pipeline_mode = #tpu.pipeline_mode<synchronous>, transform_indices = @transform_2, window_bounds = array<i64: 1, 256>}, {pipeline_mode = #tpu.pipeline_mode<synchronous>, transform_indices = @transform_3, window_bounds = array<i64: 256, 256>}, {pipeline_mode = #tpu.pipeline_mode<synchronous>, transform_indices = @transform_4, window_bounds = array<i64: 1, 256>}, {pipeline_mode = #tpu.pipeline_mode<synchronous>, transform_indices = @transform_5, window_bounds = array<i64: 256, 192>}, {pipeline_mode = #tpu.pipeline_mode<synchronous>, transform_indices = @transform_6, window_bounds = array<i64: 1, 192>}, {transform_indices = @transform_7, window_bounds = array<i64: 64, 192>}]} {
    %c0 = arith.constant 0 : index
    %c0_0 = arith.constant 0 : index
    %0 = vector.load %arg1[%c0, %c0_0] : memref<64x24xf32, #tpu.memory_space<vmem>>, vector<64x24xf32>
    %c0_1 = arith.constant 0 : index
    %c0_2 = arith.constant 0 : index
    %1 = vector.load %arg2[%c0_1, %c0_2] : memref<24x256xf32, #tpu.memory_space<vmem>>, vector<24x256xf32>
    %cst = arith.constant dense<0.000000e+00> : vector<64x256xf32>
    %2 = tpu.matmul %0, %1, %cst {dimension_numbers = #tpu.dot_dimension_numbers<[1], [0], [0], [1], [0, 0, 1, 1], [], []>} : vector<64x24xf32>, vector<24x256xf32>, vector<64x256xf32> -> vector<64x256xf32>
    %c0_3 = arith.constant 0 : index
    %c0_4 = arith.constant 0 : index
    %3 = vector.load %arg3[%c0_3, %c0_4] : memref<1x256xf32, #tpu.memory_space<vmem>>, vector<1x256xf32>
    %4 = vector.broadcast %3 : vector<1x256xf32> to vector<64x256xf32>
    %5 = arith.addf %2, %4 : vector<64x256xf32>
    %cst_5 = arith.constant 0.000000e+00 : f32
    %6 = vector.broadcast %cst_5 : f32 to vector<64x256xf32>
    %7 = arith.cmpf oge, %5, %6 : vector<64x256xf32>
    %cst_6 = arith.constant 2.000000e-01 : f32
    %8 = vector.broadcast %cst_6 : f32 to vector<64x256xf32>
    %9 = arith.mulf %8, %5 : vector<64x256xf32>
    %10 = arith.select %7, %5, %9 : vector<64x256xi1>, vector<64x256xf32>
    %c0_7 = arith.constant 0 : index
    %c0_8 = arith.constant 0 : index
    %11 = vector.load %arg4[%c0_7, %c0_8] : memref<256x256xf32, #tpu.memory_space<vmem>>, vector<256x256xf32>
    %cst_9 = arith.constant dense<0.000000e+00> : vector<64x256xf32>
    %12 = tpu.matmul %10, %11, %cst_9 {dimension_numbers = #tpu.dot_dimension_numbers<[1], [0], [0], [1], [0, 0, 1, 1], [], []>} : vector<64x256xf32>, vector<256x256xf32>, vector<64x256xf32> -> vector<64x256xf32>
    %c0_10 = arith.constant 0 : index
    %c0_11 = arith.constant 0 : index
    %13 = vector.load %arg5[%c0_10, %c0_11] : memref<1x256xf32, #tpu.memory_space<vmem>>, vector<1x256xf32>
    %14 = vector.broadcast %13 : vector<1x256xf32> to vector<64x256xf32>
    %15 = arith.addf %12, %14 : vector<64x256xf32>
    %cst_12 = arith.constant 0.000000e+00 : f32
    %16 = vector.broadcast %cst_12 : f32 to vector<64x256xf32>
    %17 = arith.cmpf oge, %15, %16 : vector<64x256xf32>
    %cst_13 = arith.constant 2.000000e-01 : f32
    %18 = vector.broadcast %cst_13 : f32 to vector<64x256xf32>
    %19 = arith.mulf %18, %15 : vector<64x256xf32>
    %20 = arith.select %17, %15, %19 : vector<64x256xi1>, vector<64x256xf32>
    %c0_14 = arith.constant 0 : index
    %c0_15 = arith.constant 0 : index
    %21 = vector.load %arg6[%c0_14, %c0_15] : memref<256x192xf32, #tpu.memory_space<vmem>>, vector<256x192xf32>
    %cst_16 = arith.constant dense<0.000000e+00> : vector<64x192xf32>
    %22 = tpu.matmul %20, %21, %cst_16 {dimension_numbers = #tpu.dot_dimension_numbers<[1], [0], [0], [1], [0, 0, 1, 1], [], []>} : vector<64x256xf32>, vector<256x192xf32>, vector<64x192xf32> -> vector<64x192xf32>
    %c0_17 = arith.constant 0 : index
    %c0_18 = arith.constant 0 : index
    %23 = vector.load %arg7[%c0_17, %c0_18] : memref<1x192xf32, #tpu.memory_space<vmem>>, vector<1x192xf32>
    %24 = vector.broadcast %23 : vector<1x192xf32> to vector<64x192xf32>
    %25 = arith.addf %22, %24 : vector<64x192xf32>
    %cst_19 = arith.constant 0.000000e+00 : f32
    %26 = vector.broadcast %cst_19 : f32 to vector<64x192xf32>
    %27 = arith.cmpf oge, %25, %26 : vector<64x192xf32>
    %cst_20 = arith.constant 2.000000e-01 : f32
    %28 = vector.broadcast %cst_20 : f32 to vector<64x192xf32>
    %29 = arith.mulf %28, %25 : vector<64x192xf32>
    %30 = arith.select %27, %25, %29 : vector<64x192xi1>, vector<64x192xf32>
    %c0_21 = arith.constant 0 : index
    %c0_22 = arith.constant 0 : index
    %31 = vector.load %arg8[%c0_21, %c0_22] : memref<64x192xf32, #tpu.memory_space<vmem>>, vector<64x192xf32>
    tpu.vector_store %arg8[%c0_21, %c0_22], %30 {strides = array<i32>} : memref<64x192xf32, #tpu.memory_space<vmem>>, vector<64x192xf32>,
    return
  }
  func.func @transform_0(%arg0: i32) -> (i32, i32) {
    %c0_i32 = arith.constant 0 : i32
    %c0_i32_0 = arith.constant 0 : i32
    return %arg0, %c0_i32 : i32, i32
  }
  func.func @transform_1(%arg0: i32) -> (i32, i32) {
    %c0_i32 = arith.constant 0 : i32
    %c0_i32_0 = arith.constant 0 : i32
    %c0_i32_1 = arith.constant 0 : i32
    return %c0_i32, %c0_i32_0 : i32, i32
  }
  func.func @transform_2(%arg0: i32) -> (i32, i32) {
    %c0_i32 = arith.constant 0 : i32
    %c0_i32_0 = arith.constant 0 : i32
    %c0_i32_1 = arith.constant 0 : i32
    return %c0_i32, %c0_i32_0 : i32, i32
  }
  func.func @transform_3(%arg0: i32) -> (i32, i32) {
    %c0_i32 = arith.constant 0 : i32
    %c0_i32_0 = arith.constant 0 : i32
    %c0_i32_1 = arith.constant 0 : i32
    return %c0_i32, %c0_i32_0 : i32, i32
  }
  func.func @transform_4(%arg0: i32) -> (i32, i32) {
    %c0_i32 = arith.constant 0 : i32
    %c0_i32_0 = arith.constant 0 : i32
    %c0_i32_1 = arith.constant 0 : i32
    return %c0_i32, %c0_i32_0 : i32, i32
  }
  func.func @transform_5(%arg0: i32) -> (i32, i32) {
    %c0_i32 = arith.constant 0 : i32
    %c0_i32_0 = arith.constant 0 : i32
    %c0_i32_1 = arith.constant 0 : i32
    return %c0_i32, %c0_i32_0 : i32, i32
  }
  func.func @transform_6(%arg0: i32) -> (i32, i32) {
    %c0_i32 = arith.constant 0 : i32
    %c0_i32_0 = arith.constant 0 : i32
    %c0_i32_1 = arith.constant 0 : i32
    return %c0_i32, %c0_i32_0 : i32, i32
  }
  func.func @transform_7(%arg0: i32) -> (i32, i32) {
    %c0_i32 = arith.constant 0 : i32
    %c0_i32_0 = arith.constant 0 : i32
    return %arg0, %c0_i32 : i32, i32
  }
}

</mosaic_0001>

<bundles_post_ra>
// kernel: tpu_custom_call.1
= control target key start
LH: loop header
LB: loop body
LE: loop exit
PB: predicated region body
PF: predicated region fallthrough
CT: control target
= control target key end

     0   :  { %vm47_vm0 = vcmask 195584   ;;  %s1418_s0 = inlined_call_operand.vmem [shape: f32[64,24], index: 0, kind: input, shape index: {}]   ;;  %s1419_s1 = inlined_call_operand.vmem [shape: f32[24,256], index: 1, kind: input, shape index: {}]   ;;  %s1420_s2 = inlined_call_operand.vmem [shape: f32[1,256], index: 2, kind: input, shape index: {}]   ;;  %s1421_s3 = inlined_call_operand.vmem [shape: f32[256,256], index: 3, kind: input, shape index: {}]   ;;  %s1422_s4 = inlined_call_operand.vmem [shape: f32[1,256], index: 4, kind: input, shape index: {}]   ;;  %s1423_s5 = inlined_call_operand.vmem [shape: f32[256,192], index: 5, kind: input, shape index: {}]   ;;  %s1424_s6 = inlined_call_operand.vmem [shape: f32[1,192], index: 6, kind: input, shape index: {}]   ;;  %s1425_s7 = inlined_call_operand.hbm [shape: f32[64,192], index: 7, kind: output, shape index: {}]  }
   0x1   :  { %v39_v0 = vld [vmem:[%s1419_s1 + $0x20] sm:$0xff]  ;;  %v40_v1 = vld [vmem:[%s1419_s1 + $0x28] sm:$0xff]  ;;  %v37_v2 = vld [vmem:[%s1419_s1 + $0x10] sm:$0xff] }
   0x2   :  { %85 = vmatpush.msra.mxu0 %v39_v0  ;;  %126 = vmatpush.msra.mxu1 %v40_v1  ;;  %v38_v3 = vld [vmem:[%s1419_s1 + $0x18] sm:$0xff]  ;;  %v35_v4 = vld [vmem:[%s1419_s1] sm:$0xff]  ;;  %v36_v5 = vld [vmem:[%s1419_s1 + $0x8] sm:$0xff] }
   0x3   :  { %817 = vmatpush.msra.mxu2 %v39_v0  ;;  %820 = vmatpush.msra.mxu3 %v40_v1  ;;  %v27_v6 = vld [vmem:[%s1418_s0] sm:$0xff]  ;;  %v232_v8 = vld [vmem:[%s1421_s3 + $0xf0] sm:$0xff]  ;;  %v233_v10 = vld [vmem:[%s1421_s3 + $0xf8] sm:$0xff] }
   0x4   :  { %86 = vmatpush.msra.mxu0 %v37_v2  ;;  %127 = vmatpush.msra.mxu1 %v38_v3  ;;  %v31_v7 = vld [vmem:[%s1418_s0 + $0x20] sm:$0xff]  ;;  %v264_v9 = vld [vmem:[%s1421_s3 + $0x1f0] sm:$0xff]  ;;  %v265_v11 = vld [vmem:[%s1421_s3 + $0x1f8] sm:$0xff] }
   0x5   :  { %818 = vmatpush.msra.mxu2 %v37_v2  ;;  %821 = vmatpush.msra.mxu3 %v38_v3  ;;  %v230_v12 = vld [vmem:[%s1421_s3 + $0xe0] sm:$0xff]  ;;  %v231_v14 = vld [vmem:[%s1421_s3 + $0xe8] sm:$0xff]  ;;  %v228_v16 = vld [vmem:[%s1421_s3 + $0xd0] sm:$0xff] }
   0x6   :  { %87 = vmatpush.msra.mxu0 %v35_v4  ;;  %128 = vmatpush.msra.mxu1 %v36_v5  ;;  %v262_v13 = vld [vmem:[%s1421_s3 + $0x1e0] sm:$0xff]  ;;  %v263_v15 = vld [vmem:[%s1421_s3 + $0x1e8] sm:$0xff]  ;;  %v260_v17 = vld [vmem:[%s1421_s3 + $0x1d0] sm:$0xff] }
   0x7   :  { %801 = vmatmul.msk.f32.vlgmr.msra.gmra.mxu0 %vm47_vm0, %v27_v6  ;;  %809 = vmatmul.msk.f32.vlgmr.msra.gmra.mxu1 %vm47_vm0, %v27_v6  ;;  %v28_v18 = vld [vmem:[%s1418_s0 + $0x8] sm:$0xff]  ;;  %v229_v19 = vld [vmem:[%s1421_s3 + $0xd8] sm:$0xff]  ;;  %v226_v22 = vld [vmem:[%s1421_s3 + $0xc0] sm:$0xff] }
   0x8   :  { %819 = vmatpush.msra.mxu2 %v35_v4  ;;  %822 = vmatpush.msra.mxu3 %v36_v5  ;;  %v261_v20 = vld [vmem:[%s1421_s3 + $0x1d8] sm:$0xff]  ;;  %v32_v21 = vld [vmem:[%s1418_s0 + $0x28] sm:$0xff]  ;;  %v258_v23 = vld [vmem:[%s1421_s3 + $0x1c0] sm:$0xff] }
   0x9   :  { %805 = vmatmul.msk.f32.vlgmr.msra.gmra.mxu2 %vm47_vm0, %v31_v7  ;;  %813 = vmatmul.msk.f32.vlgmr.msra.gmra.mxu3 %vm47_vm0, %v31_v7  ;;  %v227_v24 = vld [vmem:[%s1421_s3 + $0xc8] sm:$0xff]  ;;  %v224_v26 = vld [vmem:[%s1421_s3 + $0xb0] sm:$0xff]  ;;  %v225_v28 = vld [vmem:[%s1421_s3 + $0xb8] sm:$0xff] }
   0xa   :  { %272 = vmatpush.msrb.mxu2 %v232_v8  ;;  %313 = vmatpush.msrb.mxu3 %v264_v9  ;;  %v259_v25 = vld [vmem:[%s1421_s3 + $0x1c8] sm:$0xff]  ;;  %v256_v27 = vld [vmem:[%s1421_s3 + $0x1b0] sm:$0xff]  ;;  %v257_v29 = vld [vmem:[%s1421_s3 + $0x1b8] sm:$0xff] }
   0xb   :  { %354 = vmatpush.msrb.mxu0 %v233_v10  ;;  %395 = vmatpush.msrb.mxu1 %v265_v11  ;;  %v222_v30 = vld [vmem:[%s1421_s3 + $0xa0] sm:$0xff]  ;;  %v29_v32 = vld [vmem:[%s1418_s0 + $0x10] sm:$0xff]  ;;  %v223_v33 = vld [vmem:[%s1421_s3 + $0xa8] sm:$0xff] }
   0xc   :  { %273 = vmatpush.msrb.mxu2 %v230_v12  ;;  %314 = vmatpush.msrb.mxu3 %v262_v13  ;;  %v254_v31 = vld [vmem:[%s1421_s3 + $0x1a0] sm:$0xff]  ;;  %v255_v34 = vld [vmem:[%s1421_s3 + $0x1a8] sm:$0xff]  ;;  %v33_v35 = vld [vmem:[%s1418_s0 + $0x30] sm:$0xff] }
   0xd   :  { %355 = vmatpush.msrb.mxu0 %v231_v14  ;;  %396 = vmatpush.msrb.mxu1 %v263_v15  ;;  %v220_v36 = vld [vmem:[%s1421_s3 + $0x90] sm:$0xff] }
   0xe   :  { %274 = vmatpush.msrb.mxu2 %v228_v16  ;;  %315 = vmatpush.msrb.mxu3 %v260_v17  ;;  %v252_v37 = vld [vmem:[%s1421_s3 + $0x190] sm:$0xff] }
   0xf   :  { %802 = vmatmul.msk.f32.gmra.mxu0 %vm47_vm0, %v28_v18  ;;  %810 = vmatmul.msk.f32.gmra.mxu1 %vm47_vm0, %v28_v18 }
  0x10   :  { %356 = vmatpush.msrb.mxu0 %v229_v19  ;;  %397 = vmatpush.msrb.mxu1 %v261_v20 }
  0x11   :  { %806 = vmatmul.msk.f32.gmra.mxu2 %vm47_vm0, %v32_v21  ;;  %814 = vmatmul.msk.f32.gmra.mxu3 %vm47_vm0, %v32_v21 }
  0x12   :  { %275 = vmatpush.msrb.mxu2 %v226_v22  ;;  %316 = vmatpush.msrb.mxu3 %v258_v23 }
  0x13   :  { %357 = vmatpush.msrb.mxu0 %v227_v24  ;;  %398 = vmatpush.msrb.mxu1 %v259_v25 }
  0x14   :  { %276 = vmatpush.msrb.mxu2 %v224_v26  ;;  %317 = vmatpush.msrb.mxu3 %v256_v27 }
  0x15   :  { %358 = vmatpush.msrb.mxu0 %v225_v28  ;;  %399 = vmatpush.msrb.mxu1 %v257_v29 }
  0x16   :  { %277 = vmatpush.msrb.mxu2 %v222_v30  ;;  %318 = vmatpush.msrb.mxu3 %v254_v31 }
  0x17   :  { %803 = vmatmul.msk.f32.gmra.mxu0 %vm47_vm0, %v29_v32  ;;  %811 = vmatmul.msk.f32.gmra.mxu1 %vm47_vm0, %v29_v32 }
  0x18   :  { %12 = vsyncpa [#allocation3], 0  ;;  %359 = vmatpush.msrb.mxu0 %v223_v33  ;;  %400 = vmatpush.msrb.mxu1 %v255_v34  ;;  %v221_v38 = vld [vmem:[%s1421_s3 + $0x98] sm:$0xff]  ;;  %v218_v40 = vld [vmem:[%s1421_s3 + $0x80] sm:$0xff]  ;;  %s853_s11 = smov 256  }
  0x19   :  { %v253_v39 = vld [vmem:[%s1421_s3 + $0x198] sm:$0xff]  ;;  %807 = vmatmul.msk.f32.gmra.mxu2 %vm47_vm0, %v33_v35  ;;  %815 = vmatmul.msk.f32.gmra.mxu3 %vm47_vm0, %v33_v35  ;;  %v250_v41 = vld [vmem:[%s1421_s3 + $0x180] sm:$0xff]  ;;  %v219_v42 = vld [vmem:[%s1421_s3 + $0x88] sm:$0xff] }
  0x1a   :  { %278 = vmatpush.msrb.mxu2 %v220_v36  ;;  %319 = vmatpush.msrb.mxu3 %v252_v37  ;;  %v251_v43 = vld [vmem:[%s1421_s3 + $0x188] sm:$0xff]  ;;  %v216_v44 = vld [vmem:[%s1421_s3 + $0x70] sm:$0xff]  ;;  %v30_v46 = vld [vmem:[%s1418_s0 + $0x18] sm:$0xff] }
  0x1b   :  { %360 = vmatpush.msrb.mxu0 %v221_v38  ;;  %401 = vmatpush.msrb.mxu1 %v253_v39  ;;  %v248_v45 = vld [vmem:[%s1421_s3 + $0x170] sm:$0xff]  ;;  %v217_v47 = vld [vmem:[%s1421_s3 + $0x78] sm:$0xff]  ;;  %v214_v50 = vld [vmem:[%s1421_s3 + $0x60] sm:$0xff] }
  0x1c   :  { %279 = vmatpush.msrb.mxu2 %v218_v40  ;;  %320 = vmatpush.msrb.mxu3 %v250_v41  ;;  %v249_v48 = vld [vmem:[%s1421_s3 + $0x178] sm:$0xff]  ;;  %v246_v51 = vld [vmem:[%s1421_s3 + $0x160] sm:$0xff]  ;;  %v215_v52 = vld [vmem:[%s1421_s3 + $0x68] sm:$0xff] }
  0x1d   :  { %361 = vmatpush.msrb.mxu0 %v219_v42  ;;  %402 = vmatpush.msrb.mxu1 %v251_v43  ;;  %v34_v49 = vld [vmem:[%s1418_s0 + $0x38] sm:$0xff]  ;;  %v247_v53 = vld [vmem:[%s1421_s3 + $0x168] sm:$0xff]  ;;  %v212_v54 = vld [vmem:[%s1421_s3 + $0x50] sm:$0xff]  ;;  %s789_s0 = sshll.u32 %s1425_s7, 4  ;;  %s790_s0 = int_to_ptr.hbm [resolvable:$true] %s789_s0 }
  0x1e   :  { %280 = vmatpush.msrb.mxu2 %v216_v44  ;;  %321 = vmatpush.msrb.mxu3 %v248_v45  ;;  %v244_v55 = vld [vmem:[%s1421_s3 + $0x150] sm:$0xff]  ;;  %v213_v56 = vld [vmem:[%s1421_s3 + $0x58] sm:$0xff]  ;;  %v210_v58 = vld [vmem:[%s1421_s3 + $0x40] sm:$0xff] }
  0x1f   :  { %804 = vmatmul.msk.f32.gmra.mxu0 %vm47_vm0, %v30_v46  ;;  %812 = vmatmul.msk.f32.gmra.mxu1 %vm47_vm0, %v30_v46  ;;  %v245_v57 = vld [vmem:[%s1421_s3 + $0x158] sm:$0xff]  ;;  %v242_v59 = vld [vmem:[%s1421_s3 + $0x140] sm:$0xff]  ;;  %v211_v60 = vld [vmem:[%s1421_s3 + $0x48] sm:$0xff] }
  0x20   :  { %362 = vmatpush.msrb.mxu0 %v217_v47  ;;  %403 = vmatpush.msrb.mxu1 %v249_v48  ;;  %v243_v61 = vld [vmem:[%s1421_s3 + $0x148] sm:$0xff]  ;;  %v208_v62 = vld [vmem:[%s1421_s3 + $0x30] sm:$0xff]  ;;  %v209_v0 = vld [vmem:[%s1421_s3 + $0x38] sm:$0xff] }
  0x21   :  { %808 = vmatmul.msk.f32.gmra.mxu2 %vm47_vm0, %v34_v49  ;;  %816 = vmatmul.msk.f32.gmra.mxu3 %vm47_vm0, %v34_v49  ;;  %v240_v63 = vld [vmem:[%s1421_s3 + $0x130] sm:$0xff]  ;;  %v241_v1 = vld [vmem:[%s1421_s3 + $0x138] sm:$0xff]  ;;  %v206_v2 = vld [vmem:[%s1421_s3 + $0x20] sm:$0xff] }
  0x22   :  { %281 = vmatpush.msrb.mxu2 %v214_v50  ;;  %322 = vmatpush.msrb.mxu3 %v246_v51  ;;  %v238_v3 = vld [vmem:[%s1421_s3 + $0x120] sm:$0xff]  ;;  %v207_v4 = vld [vmem:[%s1421_s3 + $0x28] sm:$0xff]  ;;  %v204_v6 = vld [vmem:[%s1421_s3 + $0x10] sm:$0xff] }
  0x23   :  { %363 = vmatpush.msrb.mxu0 %v215_v52  ;;  %404 = vmatpush.msrb.mxu1 %v247_v53  ;;  %v239_v5 = vld [vmem:[%s1421_s3 + $0x128] sm:$0xff]  ;;  %v236_v7 = vld [vmem:[%s1421_s3 + $0x110] sm:$0xff]  ;;  %v205_v8 = vld [vmem:[%s1421_s3 + $0x18] sm:$0xff] }
  0x24   :  { %282 = vmatpush.msrb.mxu2 %v212_v54  ;;  %323 = vmatpush.msrb.mxu3 %v244_v55  ;;  %v237_v9 = vld [vmem:[%s1421_s3 + $0x118] sm:$0xff]  ;;  %v202_v10 = vld [vmem:[%s1421_s3] sm:$0xff]  ;;  %v203_v12 = vld [vmem:[%s1421_s3 + $0x8] sm:$0xff] }
  0x25   :  { %364 = vmatpush.msrb.mxu0 %v213_v56  ;;  %405 = vmatpush.msrb.mxu1 %v245_v57  ;;  %v234_v11 = vld [vmem:[%s1421_s3 + $0x100] sm:$0xff]  ;;  %v235_v13 = vld [vmem:[%s1421_s3 + $0x108] sm:$0xff]  ;;  %v514_v56 = vld [vmem:[%s1423_s5 + $0xf0] sm:$0xff] }
  0x26   :  { %283 = vmatpush.msrb.mxu2 %v210_v58  ;;  %324 = vmatpush.msrb.mxu3 %v242_v59  ;;  %v41_v14 = vld [vmem:[%s1420_s2] sm:$0x3]  ;;  %v546_v57 = vld [vmem:[%s1423_s5 + $0x1f0] sm:$0xff]  ;;  %s854_s2 = smov 16  }
  0x27   :  { %365 = vmatpush.msrb.mxu0 %v211_v60  ;;  %406 = vmatpush.msrb.mxu1 %v243_v61  ;;  %v1148_v15 = vperm.slane %v41_v14, 0  ;;  %v1150_v16 = vperm.slane %v41_v14, 1  ;;  %v512_v58 = vld [vmem:[%s1423_s5 + $0xe0] sm:$0xff]  ;;  %v515_v60 = vld [vmem:[%s1423_s5 + $0xf8] sm:$0xff]  ;;  %v510_v61 = vld [vmem:[%s1423_s5 + $0xd0] sm:$0xff] }
  0x28   :  { %284 = vmatpush.msrb.mxu2 %v208_v62  ;;  %325 = vmatpush.msrb.mxu3 %v240_v63  ;;  %v544_v59 = vld [vmem:[%s1423_s5 + $0x1e0] sm:$0xff]  ;;  %v547_v63 = vld [vmem:[%s1423_s5 + $0x1f8] sm:$0xff]  ;;  %v506_v14 = vld [vmem:[%s1423_s5 + $0xb0] sm:$0xff] }
  0x29   :  { %366 = vmatpush.msrb.mxu0 %v209_v0  ;;  %407 = vmatpush.msrb.mxu1 %v241_v1  ;;  %v542_v0 = vld [vmem:[%s1423_s5 + $0x1d0] sm:$0xff]  ;;  %v513_v1 = vld [vmem:[%s1423_s5 + $0xe8] sm:$0xff] }
  0x2a   :  { %285 = vmatpush.msrb.mxu2 %v206_v2  ;;  %326 = vmatpush.msrb.mxu3 %v238_v3  ;;  %v545_v2 = vld [vmem:[%s1423_s5 + $0x1e8] sm:$0xff] }
  0x2b   :  { %367 = vmatpush.msrb.mxu0 %v207_v4  ;;  %408 = vmatpush.msrb.mxu1 %v239_v5  ;;  %v511_v5 = vld [vmem:[%s1423_s5 + $0xd8] sm:$0xff] }
  0x2c   :  { %286 = vmatpush.msrb.mxu2 %v204_v6  ;;  %327 = vmatpush.msrb.mxu3 %v236_v7 }
  0x2d   :  { %368 = vmatpush.msrb.mxu0 %v205_v8  ;;  %409 = vmatpush.msrb.mxu1 %v237_v9  ;;  %v508_v8 = vld [vmem:[%s1423_s5 + $0xc0] sm:$0xff] }
  0x2e   :  { %287 = vmatpush.msrb.mxu2 %v202_v10  ;;  %328 = vmatpush.msrb.mxu3 %v234_v11  ;;  %v540_v9 = vld [vmem:[%s1423_s5 + $0x1c0] sm:$0xff]  ;;  %v543_v11 = vld [vmem:[%s1423_s5 + $0x1d8] sm:$0xff] }
  0x2f   :  { %369 = vmatpush.msrb.mxu0 %v203_v12  ;;  %410 = vmatpush.msrb.mxu1 %v235_v13  ;;  %v509_v12 = vld [vmem:[%s1423_s5 + $0xc8] sm:$0xff] }
  0x30   :  { %554 = vmatpush.msra.mxu2 %v514_v56  ;;  %595 = vmatpush.msra.mxu3 %v546_v57  ;;  %v495_v56 = vld [vmem:[%s1423_s5 + $0x58] sm:$0xff] }
  0x31   :  { %636 = vmatpush.msra.mxu0 %v515_v60  ;;  %677 = vmatpush.msra.mxu1 %v547_v63  ;;  %v527_v60 = vld [vmem:[%s1423_s5 + $0x158] sm:$0xff]  ;;  %v490_v63 = vld [vmem:[%s1423_s5 + $0x30] sm:$0xff] }
  0x32   :  { %555 = vmatpush.msra.mxu2 %v512_v58  ;;  %596 = vmatpush.msra.mxu3 %v544_v59  ;;  %v492_v58 = vld [vmem:[%s1423_s5 + $0x40] sm:$0xff] }
  0x33   :  { %637 = vmatpush.msra.mxu0 %v513_v1  ;;  %678 = vmatpush.msra.mxu1 %v545_v2  ;;  %v524_v59 = vld [vmem:[%s1423_s5 + $0x140] sm:$0xff]  ;;  %v522_v1 = vld [vmem:[%s1423_s5 + $0x130] sm:$0xff]  ;;  %v523_v2 = vld [vmem:[%s1423_s5 + $0x138] sm:$0xff] }
  0x34   :  { %556 = vmatpush.msra.mxu2 %v510_v61  ;;  %597 = vmatpush.msra.mxu3 %v542_v0  ;;  %v525_v0 = vld [vmem:[%s1423_s5 + $0x148] sm:$0xff] }
  0x35   :  { %638 = vmatpush.msra.mxu0 %v511_v5  ;;  %679 = vmatpush.msra.mxu1 %v543_v11  ;;  %v493_v5 = vld [vmem:[%s1423_s5 + $0x48] sm:$0xff] }
  0x36   :  { %557 = vmatpush.msra.mxu2 %v508_v8  ;;  %598 = vmatpush.msra.mxu3 %v540_v9  ;;  %v488_v8 = vld [vmem:[%s1423_s5 + $0x20] sm:$0xff]  ;;  %v491_v9 = vld [vmem:[%s1423_s5 + $0x38] sm:$0xff]  ;;  %v517_v11 = vld [vmem:[%s1423_s5 + $0x108] sm:$0xff] }
  0x37   :  { %639 = vmatpush.msra.mxu0 %v509_v12  ;;  %v489_v12 = vld [vmem:[%s1423_s5 + $0x28] sm:$0xff] }
  0x38   :  { %558 = vmatpush.msra.mxu2 %v506_v14  ;;  %v487_v14 = vld [vmem:[%s1423_s5 + $0x18] sm:$0xff] }
  0x84   :  { %v89_v17 = vpop.f32.mrf.mxu0  ;;  %v130_v18 = vpop.f32.mrf.mxu1 }
  0x85   :  { %v90_v19 = vadd.f32 %v89_v17, %v1148_v15  ;;  %v131_v20 = vadd.f32 %v130_v18, %v1150_v16  ;;  %v538_v17 = vld [vmem:[%s1423_s5 + $0x1b0] sm:$0xff] }
  0x86   :  { %599 = vmatpush.msra.mxu3 %v538_v17  ;;  %v484_v17 = vld [vmem:[%s1423_s5] sm:$0xff] }
  0x87   :  { %v170_v21 = vmul.f32 0.2, %v90_v19  ;;  %v171_v22 = vmul.f32 0.2, %v131_v20  ;;  %vm154_vm1 = vcmp.ge.f32.partialorder %v90_v19, 0.0  ;;  %vm155_vm2 = vcmp.ge.f32.partialorder %v131_v20, 0.0 }
  0x89   :  { %v186_v23 = vsel %vm154_vm1, %v90_v19, %v170_v21  ;;  %v187_v24 = vsel %vm155_vm2, %v131_v20, %v171_v22  ;;  %v541_v19 = vld [vmem:[%s1423_s5 + $0x1c8] sm:$0xff]  ;;  %v507_v20 = vld [vmem:[%s1423_s5 + $0xb8] sm:$0xff]  ;;  %v504_v22 = vld [vmem:[%s1423_s5 + $0xa0] sm:$0xff] }
  0x8a   :  { %288 = vmatmul.f32.vlgmr.msrb.gmra.mxu2 %v186_v23  ;;  %329 = vmatmul.f32.vlgmr.msrb.gmra.mxu3 %v187_v24 }
  0x8b   :  { %370 = vmatmul.f32.vlgmr.msrb.gmra.mxu0 %v186_v23  ;;  %411 = vmatmul.f32.vlgmr.msrb.gmra.mxu1 %v187_v24  ;;  %v536_v23 = vld [vmem:[%s1423_s5 + $0x1a0] sm:$0xff]  ;;  %v539_v24 = vld [vmem:[%s1423_s5 + $0x1b8] sm:$0xff] }
  0x8c   :  { %v92_v25 = vpop.f32.mrf.mxu0  ;;  %v133_v26 = vpop.f32.mrf.mxu1  ;;  %680 = vmatpush.msra.mxu1 %v541_v19  ;;  %640 = vmatpush.msra.mxu0 %v507_v20  ;;  %v266_v19 = vld [vmem:[%s1422_s4] sm:$0x3] }
  0x8d   :  { %v93_v27 = vadd.f32 %v92_v25, %v1148_v15  ;;  %v134_v28 = vadd.f32 %v133_v26, %v1150_v16  ;;  %v142_v37 = vpop.f32.mrf.mxu3  ;;  %v101_v40 = vpop.f32.mrf.mxu2  ;;  %v505_v25 = vld [vmem:[%s1423_s5 + $0xa8] sm:$0xff]  ;;  %559 = vmatpush.msra.mxu2 %v504_v22  ;;  %600 = vmatpush.msra.mxu3 %v536_v23  ;;  %v1364_v20 = vperm.slane %v266_v19, 1 }
  0x8e   :  { %v143_v47 = vadd.f32 %v142_v37, %v1150_v16  ;;  %v102_v51 = vadd.f32 %v101_v40, %v1148_v15  ;;  %681 = vmatpush.msra.mxu1 %v539_v24  ;;  %641 = vmatpush.msra.mxu0 %v505_v25  ;;  %v1367_v24 = vperm.slane %v266_v19, 0 }
  0x8f   :  { %vm156_vm3 = vcmp.ge.f32.partialorder %v93_v27, 0.0  ;;  %v172_v29 = vmul.f32 0.2, %v93_v27  ;;  %vm157_vm4 = vcmp.ge.f32.partialorder %v134_v28, 0.0  ;;  %v173_v30 = vmul.f32 0.2, %v134_v28 }
  0x90   :  { %v179_v55 = vmul.f32 0.2, %v143_v47  ;;  %vm163_vm9 = vcmp.ge.f32.partialorder %v143_v47, 0.0  ;;  %v178_v62 = vmul.f32 0.2, %v102_v51  ;;  %vm162_vm10 = vcmp.ge.f32.partialorder %v102_v51, 0.0 }
  0x91   :  { %v188_v31 = vsel %vm156_vm3, %v93_v27, %v172_v29  ;;  %v189_v32 = vsel %vm157_vm4, %v134_v28, %v173_v30  ;;  %v502_v30 = vld [vmem:[%s1423_s5 + $0x90] sm:$0xff] }
  0x92   :  { %291 = vmatmul.f32.gmra.mxu2 %v188_v31  ;;  %332 = vmatmul.f32.gmra.mxu3 %v189_v32  ;;  %v195_v3 = vsel %vm163_vm9, %v143_v47, %v179_v55  ;;  %v194_v7 = vsel %vm162_vm10, %v102_v51, %v178_v62  ;;  %v528_v51 = vld [vmem:[%s1423_s5 + $0x160] sm:$0xff]  ;;  %v529_v55 = vld [vmem:[%s1423_s5 + $0x168] sm:$0xff] }
  0x93   :  { %373 = vmatmul.f32.gmra.mxu0 %v188_v31  ;;  %414 = vmatmul.f32.gmra.mxu1 %v189_v32  ;;  %v534_v31 = vld [vmem:[%s1423_s5 + $0x190] sm:$0xff]  ;;  %v537_v32 = vld [vmem:[%s1423_s5 + $0x1a8] sm:$0xff] }
  0x94   :  { %v95_v33 = vpop.f32.mrf.mxu0  ;;  %v136_v34 = vpop.f32.mrf.mxu1  ;;  %560 = vmatpush.msra.mxu2 %v502_v30  ;;  %601 = vmatpush.msra.mxu3 %v534_v31 }
  0x95   :  { %v96_v35 = vadd.f32 %v95_v33, %v1148_v15  ;;  %v137_v36 = vadd.f32 %v136_v34, %v1150_v16  ;;  %v145_v50 = vpop.f32.mrf.mxu3  ;;  %v104_v54 = vpop.f32.mrf.mxu2  ;;  %v503_v33 = vld [vmem:[%s1423_s5 + $0x98] sm:$0xff]  ;;  %682 = vmatpush.msra.mxu1 %v537_v32 }
  0x96   :  { %v146_v4 = vadd.f32 %v145_v50, %v1150_v16  ;;  %v105_v6 = vadd.f32 %v104_v54, %v1148_v15  ;;  %642 = vmatpush.msra.mxu0 %v503_v33  ;;  %v496_v50 = vld [vmem:[%s1423_s5 + $0x60] sm:$0xff]  ;;  %v526_v54 = vld [vmem:[%s1423_s5 + $0x150] sm:$0xff] }
  0x97   :  { %vm158_vm5 = vcmp.ge.f32.partialorder %v96_v35, 0.0  ;;  %v174_v38 = vmul.f32 0.2, %v96_v35  ;;  %vm159_vm6 = vcmp.ge.f32.partialorder %v137_v36, 0.0  ;;  %v175_v39 = vmul.f32 0.2, %v137_v36 }
  0x98   :  { %v181_v13 = vmul.f32 0.2, %v146_v4  ;;  %vm165_vm11 = vcmp.ge.f32.partialorder %v146_v4, 0.0  ;;  %v180_v21 = vmul.f32 0.2, %v105_v6  ;;  %vm164_vm12 = vcmp.ge.f32.partialorder %v105_v6, 0.0 }
  0x99   :  { %v190_v41 = vsel %vm158_vm5, %v96_v35, %v174_v38  ;;  %v191_v42 = vsel %vm159_vm6, %v137_v36, %v175_v39  ;;  %v500_v35 = vld [vmem:[%s1423_s5 + $0x80] sm:$0xff]  ;;  %v535_v38 = vld [vmem:[%s1423_s5 + $0x198] sm:$0xff]  ;;  %v501_v39 = vld [vmem:[%s1423_s5 + $0x88] sm:$0xff] }
  0x9a   :  { %294 = vmatmul.f32.gmra.mxu2 %v190_v41  ;;  %335 = vmatmul.f32.gmra.mxu3 %v191_v42  ;;  %v197_v26 = vsel %vm165_vm11, %v146_v4, %v181_v13  ;;  %v196_v29 = vsel %vm164_vm12, %v105_v6, %v180_v21  ;;  %v532_v36 = vld [vmem:[%s1423_s5 + $0x180] sm:$0xff]  ;;  %v521_v4 = vld [vmem:[%s1423_s5 + $0x128] sm:$0xff]  ;;  %v518_v6 = vld [vmem:[%s1423_s5 + $0x110] sm:$0xff] }
  0x9b   :  { %376 = vmatmul.f32.gmra.mxu0 %v190_v41  ;;  %417 = vmatmul.f32.gmra.mxu1 %v191_v42  ;;  %v498_v41 = vld [vmem:[%s1423_s5 + $0x70] sm:$0xff] }
  0x9c   :  { %v98_v43 = vpop.f32.mrf.mxu0  ;;  %v139_v44 = vpop.f32.mrf.mxu1  ;;  %v530_v42 = vld [vmem:[%s1423_s5 + $0x170] sm:$0xff]  ;;  %561 = vmatpush.msra.mxu2 %v500_v35  ;;  %602 = vmatpush.msra.mxu3 %v532_v36 }
  0x9d   :  { %v99_v45 = vadd.f32 %v98_v43, %v1148_v15  ;;  %v140_v46 = vadd.f32 %v139_v44, %v1150_v16  ;;  %v148_v10 = vpop.f32.mrf.mxu3  ;;  %v107_v18 = vpop.f32.mrf.mxu2  ;;  %v533_v44 = vld [vmem:[%s1423_s5 + $0x188] sm:$0xff]  ;;  %683 = vmatpush.msra.mxu1 %v535_v38  ;;  %643 = vmatpush.msra.mxu0 %v501_v39  ;;  %v486_v13 = vld [vmem:[%s1423_s5 + $0x10] sm:$0xff] }
  0x9e   :  { %v149_v27 = vadd.f32 %v148_v10, %v1150_v16  ;;  %v108_v28 = vadd.f32 %v107_v18, %v1148_v15  ;;  %562 = vmatpush.msra.mxu2 %v498_v41  ;;  %603 = vmatpush.msra.mxu3 %v530_v42  ;;  %v516_v10 = vld [vmem:[%s1423_s5 + $0x100] sm:$0xff]  ;;  %v485_v18 = vld [vmem:[%s1423_s5 + $0x8] sm:$0xff] }
  0x9f   :  { %vm160_vm7 = vcmp.ge.f32.partialorder %v99_v45, 0.0  ;;  %v176_v48 = vmul.f32 0.2, %v99_v45  ;;  %vm161_vm8 = vcmp.ge.f32.partialorder %v140_v46, 0.0  ;;  %v177_v49 = vmul.f32 0.2, %v140_v46  ;;  %684 = vmatpush.msra.mxu1 %v533_v44 }
  0xa0   :  { %v183_v34 = vmul.f32 0.2, %v149_v27  ;;  %vm167_vm13 = vcmp.ge.f32.partialorder %v149_v27, 0.0  ;;  %v182_v40 = vmul.f32 0.2, %v108_v28  ;;  %vm166_vm14 = vcmp.ge.f32.partialorder %v108_v28, 0.0  ;;  %563 = vmatpush.msra.mxu2 %v496_v50  ;;  %604 = vmatpush.msra.mxu3 %v528_v51 }
  0xa1   :  { %v192_v52 = vsel %vm160_vm7, %v99_v45, %v176_v48  ;;  %v193_v53 = vsel %vm161_vm8, %v140_v46, %v177_v49  ;;  %v499_v45 = vld [vmem:[%s1423_s5 + $0x78] sm:$0xff] }
  0xa2   :  { %297 = vmatmul.f32.gmra.mxu2 %v192_v52  ;;  %338 = vmatmul.f32.gmra.mxu3 %v193_v53  ;;  %v199_v46 = vsel %vm167_vm13, %v149_v27, %v183_v34  ;;  %v198_v49 = vsel %vm166_vm14, %v108_v28, %v182_v40 }
  0xa3   :  { %379 = vmatmul.f32.gmra.mxu0 %v192_v52  ;;  %420 = vmatmul.f32.gmra.mxu1 %v193_v53  ;;  %v494_v53 = vld [vmem:[%s1423_s5 + $0x50] sm:$0xff] }
  0xa4   :  { %644 = vmatpush.msra.mxu0 %v499_v45  ;;  %564 = vmatpush.msra.mxu2 %v494_v53 }
  0xa5   :  { %v151_v37 = vpop.f32.mrf.mxu3  ;;  %v110_v43 = vpop.f32.mrf.mxu2  ;;  %605 = vmatpush.msra.mxu3 %v526_v54 }
  0xa6   :  { %v152_v47 = vadd.f32 %v151_v37, %v1150_v16  ;;  %v111_v48 = vadd.f32 %v110_v43, %v1148_v15  ;;  %v531_v16 = vld [vmem:[%s1423_s5 + $0x178] sm:$0xff]  ;;  %v497_v15 = vld [vmem:[%s1423_s5 + $0x68] sm:$0xff]  ;;  %565 = vmatpush.msra.mxu2 %v492_v58 }
  0xa7   :  { %685 = vmatpush.msra.mxu1 %v531_v16  ;;  %645 = vmatpush.msra.mxu0 %v497_v15 }
  0xa8   :  { %v185_v52 = vmul.f32 0.2, %v152_v47  ;;  %vm169_vm15 = vcmp.ge.f32.partialorder %v152_v47, 0.0  ;;  %v184_v57 = vmul.f32 0.2, %v111_v48  ;;  %vm168_vm0 = vcmp.ge.f32.partialorder %v111_v48, 0.0  ;;  %606 = vmatpush.msra.mxu3 %v524_v59  ;;  %566 = vmatpush.msra.mxu2 %v490_v63 }
  0xa9   :  { %686 = vmatpush.msra.mxu1 %v529_v55  ;;  %646 = vmatpush.msra.mxu0 %v495_v56 }
  0xaa   :  { %300 = vmatmul.f32.gmra.mxu2 %v194_v7  ;;  %341 = vmatmul.f32.gmra.mxu3 %v195_v3  ;;  %v201_v61 = vsel %vm169_vm15, %v152_v47, %v185_v52  ;;  %v200_v62 = vsel %vm168_vm0, %v111_v48, %v184_v57 }
  0xab   :  { %382 = vmatmul.f32.gmra.mxu0 %v194_v7  ;;  %423 = vmatmul.f32.gmra.mxu1 %v195_v3  ;;  %v520_v3 = vld [vmem:[%s1423_s5 + $0x120] sm:$0xff]  ;;  %v519_v7 = vld [vmem:[%s1423_s5 + $0x118] sm:$0xff] }
  0xac   :  { %687 = vmatpush.msra.mxu1 %v527_v60  ;;  %607 = vmatpush.msra.mxu3 %v522_v1 }
  0xad   :  { %647 = vmatpush.msra.mxu0 %v493_v5  ;;  %567 = vmatpush.msra.mxu2 %v488_v8 }
  0xae   :  { %688 = vmatpush.msra.mxu1 %v525_v0  ;;  %608 = vmatpush.msra.mxu3 %v520_v3 }
  0xaf   :  { %648 = vmatpush.msra.mxu0 %v491_v9  ;;  %568 = vmatpush.msra.mxu2 %v486_v13 }
  0xb0   :  { %689 = vmatpush.msra.mxu1 %v523_v2  ;;  %609 = vmatpush.msra.mxu3 %v518_v6 }
  0xb1   :  { %649 = vmatpush.msra.mxu0 %v489_v12  ;;  %569 = vmatpush.msra.mxu2 %v484_v17 }
  0xb2   :  { %303 = vmatmul.f32.gmra.mxu2 %v196_v29  ;;  %344 = vmatmul.f32.gmra.mxu3 %v197_v26 }
  0xb3   :  { %385 = vmatmul.f32.gmra.mxu0 %v196_v29  ;;  %426 = vmatmul.f32.gmra.mxu1 %v197_v26 }
  0xb4   :  { %690 = vmatpush.msra.mxu1 %v521_v4  ;;  %610 = vmatpush.msra.mxu3 %v516_v10 }
  0xb5   :  { %650 = vmatpush.msra.mxu0 %v487_v14 }
  0xb6   :  { %691 = vmatpush.msra.mxu1 %v519_v7 }
  0xb7   :  { %651 = vmatpush.msra.mxu0 %v485_v18 }
  0xb8   :  { %692 = vmatpush.msra.mxu1 %v517_v11 }
  0xba   :  { %306 = vmatmul.f32.gmra.mxu2 %v198_v49  ;;  %347 = vmatmul.f32.gmra.mxu3 %v199_v46 }
  0xbb   :  { %388 = vmatmul.f32.gmra.mxu0 %v198_v49  ;;  %429 = vmatmul.f32.gmra.mxu1 %v199_v46 }
  0xc2   :  { %309 = vmatmul.f32.gmra.mxu2 %v200_v62  ;;  %350 = vmatmul.f32.gmra.mxu3 %v201_v61 }
  0xc3   :  { %391 = vmatmul.f32.gmra.mxu0 %v200_v62  ;;  %432 = vmatmul.f32.gmra.mxu1 %v201_v61 }
 0x108   :  { %v371_v21 = vpop.f32.mrf.mxu0  ;;  %v412_v22 = vpop.f32.mrf.mxu1 }
 0x109   :  { %v372_v23 = vadd.f32 %v371_v21, %v1364_v20 }
 0x10b   :  { %v413_v25 = vadd.f32 %v412_v22, %v372_v23 }
 0x10d   :  { %vm437_vm1 = vcmp.ge.f32.partialorder %v413_v25, 0.0  ;;  %v453_v26 = vmul.f32 0.2, %v413_v25  ;;  %v289_v27 = vpop.f32.mrf.mxu2  ;;  %v330_v28 = vpop.f32.mrf.mxu3 }
 0x10e   :  { %v290_v29 = vadd.f32 %v289_v27, %v1367_v24 }
 0x10f   :  { %v469_v30 = vsel %vm437_vm1, %v413_v25, %v453_v26 }
 0x110   :  { %v331_v31 = vadd.f32 %v330_v28, %v290_v29  ;;  %v374_v32 = vpop.f32.mrf.mxu0  ;;  %v415_v33 = vpop.f32.mrf.mxu1  ;;  %611 = vmatmul.f32.vlgmr.msra.gmra.mxu3 %v469_v30  ;;  %693 = vmatmul.f32.vlgmr.msra.gmra.mxu1 %v469_v30 }
 0x111   :  { %v375_v34 = vadd.f32 %v374_v32, %v1364_v20 }
 0x112   :  { %vm436_vm2 = vcmp.ge.f32.partialorder %v331_v31, 0.0  ;;  %v452_v35 = vmul.f32 0.2, %v331_v31 }
 0x113   :  { %v416_v36 = vadd.f32 %v415_v33, %v375_v34 }
 0x114   :  { %v468_v37 = vsel %vm436_vm2, %v331_v31, %v452_v35  ;;  %vm767_vm2 = vcmask 523264  }
 0x115   :  { %v292_v38 = vpop.f32.mrf.mxu2  ;;  %v333_v39 = vpop.f32.mrf.mxu3  ;;  %570 = vmatmul.f32.vlgmr.msra.gmra.mxu2 %v468_v37  ;;  %652 = vmatmul.f32.vlgmr.msra.gmra.mxu0 %v468_v37  ;;  %vm439_vm3 = vcmp.ge.f32.partialorder %v416_v36, 0.0  ;;  %v455_v40 = vmul.f32 0.2, %v416_v36 }
 0x116   :  { %v293_v41 = vadd.f32 %v292_v38, %v1367_v24 }
 0x117   :  { %v471_v42 = vsel %vm439_vm3, %v416_v36, %v455_v40 }
 0x118   :  { %v334_v43 = vadd.f32 %v333_v39, %v293_v41  ;;  %v377_v44 = vpop.f32.mrf.mxu0  ;;  %v418_v45 = vpop.f32.mrf.mxu1  ;;  %614 = vmatmul.f32.gmra.mxu3 %v471_v42  ;;  %696 = vmatmul.f32.gmra.mxu1 %v471_v42 }
 0x119   :  { %v378_v46 = vadd.f32 %v377_v44, %v1364_v20 }
 0x11a   :  { %vm438_vm4 = vcmp.ge.f32.partialorder %v334_v43, 0.0  ;;  %v454_v47 = vmul.f32 0.2, %v334_v43 }
 0x11b   :  { %v419_v48 = vadd.f32 %v418_v45, %v378_v46 }
 0x11c   :  { %v470_v49 = vsel %vm438_vm4, %v334_v43, %v454_v47 }
 0x11d   :  { %v295_v50 = vpop.f32.mrf.mxu2  ;;  %v336_v51 = vpop.f32.mrf.mxu3  ;;  %573 = vmatmul.f32.gmra.mxu2 %v470_v49  ;;  %655 = vmatmul.f32.gmra.mxu0 %v470_v49  ;;  %vm441_vm5 = vcmp.ge.f32.partialorder %v419_v48, 0.0  ;;  %v457_v16 = vmul.f32 0.2, %v419_v48 }
 0x11e   :  { %v296_v15 = vadd.f32 %v295_v50, %v1367_v24 }
 0x11f   :  { %v473_v52 = vsel %vm441_vm5, %v419_v48, %v457_v16 }
 0x120   :  { %v337_v53 = vadd.f32 %v336_v51, %v296_v15  ;;  %v380_v54 = vpop.f32.mrf.mxu0  ;;  %v421_v55 = vpop.f32.mrf.mxu1  ;;  %617 = vmatmul.f32.gmra.mxu3 %v473_v52  ;;  %699 = vmatmul.f32.gmra.mxu1 %v473_v52 }
 0x121   :  { %v381_v56 = vadd.f32 %v380_v54, %v1364_v20 }
 0x122   :  { %vm440_vm6 = vcmp.ge.f32.partialorder %v337_v53, 0.0  ;;  %v456_v57 = vmul.f32 0.2, %v337_v53 }
 0x123   :  { %v422_v58 = vadd.f32 %v421_v55, %v381_v56 }
 0x124   :  { %v472_v59 = vsel %vm440_vm6, %v337_v53, %v456_v57  ;;  %v548_v53 = vld [vmem:[%s1424_s6] sm:$0x3]  ;;  %s852_s6 = smov [#allocation2]  }
 0x125   :  { %v298_v60 = vpop.f32.mrf.mxu2  ;;  %v339_v61 = vpop.f32.mrf.mxu3  ;;  %576 = vmatmul.f32.gmra.mxu2 %v472_v59  ;;  %658 = vmatmul.f32.gmra.mxu0 %v472_v59  ;;  %vm443_vm7 = vcmp.ge.f32.partialorder %v422_v58, 0.0  ;;  %v459_v62 = vmul.f32 0.2, %v422_v58  ;;  %v1387_v55 = vperm.slane %v548_v53, 1  ;;  %s787_s8 = sshll.u32 %s852_s6, 4  ;;  %s788_s8 = int_to_ptr.vmem [resolvable:$true] %s787_s8 }
 0x126   :  { %v299_v63 = vadd.f32 %v298_v60, %v1367_v24  ;;  %v1390_v60 = vperm.slane %v548_v53, 0 }
 0x127   :  { %v475_v0 = vsel %vm443_vm7, %v422_v58, %v459_v62 }
 0x128   :  { %v340_v1 = vadd.f32 %v339_v61, %v299_v63  ;;  %v383_v2 = vpop.f32.mrf.mxu0  ;;  %v424_v3 = vpop.f32.mrf.mxu1  ;;  %620 = vmatmul.f32.gmra.mxu3 %v475_v0  ;;  %702 = vmatmul.f32.gmra.mxu1 %v475_v0 }
 0x129   :  { %v384_v4 = vadd.f32 %v383_v2, %v1364_v20 }
 0x12a   :  { %vm442_vm8 = vcmp.ge.f32.partialorder %v340_v1, 0.0  ;;  %v458_v5 = vmul.f32 0.2, %v340_v1 }
 0x12b   :  { %v425_v6 = vadd.f32 %v424_v3, %v384_v4 }
 0x12c   :  { %v474_v7 = vsel %vm442_vm8, %v340_v1, %v458_v5 }
 0x12d   :  { %v301_v8 = vpop.f32.mrf.mxu2  ;;  %v342_v9 = vpop.f32.mrf.mxu3  ;;  %579 = vmatmul.f32.gmra.mxu2 %v474_v7  ;;  %661 = vmatmul.f32.gmra.mxu0 %v474_v7  ;;  %vm445_vm9 = vcmp.ge.f32.partialorder %v425_v6, 0.0  ;;  %v461_v10 = vmul.f32 0.2, %v425_v6 }
 0x12e   :  { %v302_v11 = vadd.f32 %v301_v8, %v1367_v24 }
 0x12f   :  { %v477_v12 = vsel %vm445_vm9, %v425_v6, %v461_v10 }
 0x130   :  { %v343_v13 = vadd.f32 %v342_v9, %v302_v11  ;;  %v386_v14 = vpop.f32.mrf.mxu0  ;;  %v427_v17 = vpop.f32.mrf.mxu1  ;;  %623 = vmatmul.f32.gmra.mxu3 %v477_v12  ;;  %705 = vmatmul.f32.gmra.mxu1 %v477_v12 }
 0x131   :  { %v387_v18 = vadd.f32 %v386_v14, %v1364_v20 }
 0x132   :  { %vm444_vm10 = vcmp.ge.f32.partialorder %v343_v13, 0.0  ;;  %v460_v19 = vmul.f32 0.2, %v343_v13 }
 0x133   :  { %v428_v21 = vadd.f32 %v427_v17, %v387_v18 }
 0x134   :  { %v476_v22 = vsel %vm444_vm10, %v343_v13, %v460_v19 }
 0x135   :  { %v304_v23 = vpop.f32.mrf.mxu2  ;;  %v345_v25 = vpop.f32.mrf.mxu3  ;;  %582 = vmatmul.f32.gmra.mxu2 %v476_v22  ;;  %664 = vmatmul.f32.gmra.mxu0 %v476_v22  ;;  %vm447_vm11 = vcmp.ge.f32.partialorder %v428_v21, 0.0  ;;  %v463_v26 = vmul.f32 0.2, %v428_v21 }
 0x136   :  { %v305_v27 = vadd.f32 %v304_v23, %v1367_v24 }
 0x137   :  { %v479_v28 = vsel %vm447_vm11, %v428_v21, %v463_v26 }
 0x138   :  { %v346_v29 = vadd.f32 %v345_v25, %v305_v27  ;;  %v389_v30 = vpop.f32.mrf.mxu0  ;;  %v430_v31 = vpop.f32.mrf.mxu1  ;;  %626 = vmatmul.f32.gmra.mxu3 %v479_v28  ;;  %708 = vmatmul.f32.gmra.mxu1 %v479_v28 }
 0x139   :  { %v390_v32 = vadd.f32 %v389_v30, %v1364_v20 }
 0x13a   :  { %vm446_vm12 = vcmp.ge.f32.partialorder %v346_v29, 0.0  ;;  %v462_v33 = vmul.f32 0.2, %v346_v29 }
 0x13b   :  { %v431_v34 = vadd.f32 %v430_v31, %v390_v32 }
 0x13c   :  { %v478_v35 = vsel %vm446_vm12, %v346_v29, %v462_v33 }
 0x13d   :  { %v307_v36 = vpop.f32.mrf.mxu2  ;;  %v348_v37 = vpop.f32.mrf.mxu3  ;;  %585 = vmatmul.f32.gmra.mxu2 %v478_v35  ;;  %667 = vmatmul.f32.gmra.mxu0 %v478_v35  ;;  %vm449_vm13 = vcmp.ge.f32.partialorder %v431_v34, 0.0  ;;  %v465_v38 = vmul.f32 0.2, %v431_v34 }
 0x13e   :  { %v308_v39 = vadd.f32 %v307_v36, %v1367_v24 }
 0x13f   :  { %v481_v40 = vsel %vm449_vm13, %v431_v34, %v465_v38 }
 0x140   :  { %v349_v41 = vadd.f32 %v348_v37, %v308_v39  ;;  %v392_v42 = vpop.f32.mrf.mxu0  ;;  %629 = vmatmul.f32.gmra.mxu3 %v481_v40  ;;  %711 = vmatmul.f32.gmra.mxu1 %v481_v40  ;;  %v433_v44 = vpop.f32.mrf.mxu1 }
 0x141   :  { %v393_v43 = vadd.f32 %v392_v42, %v1364_v20 }
 0x142   :  { %vm448_vm14 = vcmp.ge.f32.partialorder %v349_v41, 0.0  ;;  %v464_v45 = vmul.f32 0.2, %v349_v41 }
 0x143   :  { %v434_v46 = vadd.f32 %v433_v44, %v393_v43 }
 0x144   :  { %v480_v47 = vsel %vm448_vm14, %v349_v41, %v464_v45 }
 0x145   :  { %v310_v48 = vpop.f32.mrf.mxu2  ;;  %588 = vmatmul.f32.gmra.mxu2 %v480_v47  ;;  %670 = vmatmul.f32.gmra.mxu0 %v480_v47  ;;  %vm451_vm15 = vcmp.ge.f32.partialorder %v434_v46, 0.0  ;;  %v467_v49 = vmul.f32 0.2, %v434_v46  ;;  %v351_v51 = vpop.f32.mrf.mxu3 }
 0x146   :  { %v311_v50 = vadd.f32 %v310_v48, %v1367_v24 }
 0x147   :  { %v483_v16 = vsel %vm451_vm15, %v434_v46, %v467_v49 }
 0x148   :  { %v352_v15 = vadd.f32 %v351_v51, %v311_v50  ;;  %632 = vmatmul.f32.gmra.mxu3 %v483_v16  ;;  %714 = vmatmul.f32.gmra.mxu1 %v483_v16 }
 0x14a   :  { %vm450_vm0 = vcmp.ge.f32.partialorder %v352_v15, 0.0  ;;  %v466_v52 = vmul.f32 0.2, %v352_v15 }
 0x14c   :  { %v482_v20 = vsel %vm450_vm0, %v352_v15, %v466_v52 }
 0x14d   :  { %591 = vmatmul.f32.gmra.mxu2 %v482_v20  ;;  %673 = vmatmul.f32.gmra.mxu0 %v482_v20 }
 0x18d   :  { %v694_v54 = vpop.f32.mrf.mxu1 }
 0x192   :  { %v653_v56 = vpop.f32.mrf.mxu0 }
 0x193   :  { %v612_v57 = vpop.f32.mrf.mxu3  ;;  %v654_v24 = vadd.f32 %v653_v56, %v1387_v55 }
 0x195   :  { %v695_v58 = vadd.f32 %v694_v54, %v654_v24  ;;  %v697_v59 = vpop.f32.mrf.mxu1 }
 0x197   :  { %vm719_vm1 = vcmp.ge.f32.partialorder %v695_v58, 0.0  ;;  %v735_v61 = vmul.f32 0.2, %v695_v58 }
 0x198   :  { %v571_v62 = vpop.f32.mrf.mxu2 }
 0x199   :  { %v751_v63 = vsel %vm719_vm1, %v695_v58, %v735_v61  ;;  %v572_v0 = vadd.f32 %v571_v62, %v1390_v60 }
 0x19a   :  { %768 = vst.msk [vmem:[#allocation2 + $0x8] sm:$0xff] %vm767_vm2, %v751_v63  ;;  %v656_v1 = vpop.f32.mrf.mxu0 }
 0x19b   :  { %v613_v2 = vadd.f32 %v612_v57, %v572_v0  ;;  %v615_v3 = vpop.f32.mrf.mxu3  ;;  %v657_v4 = vadd.f32 %v656_v1, %v1387_v55 }
 0x19d   :  { %vm718_vm3 = vcmp.ge.f32.partialorder %v613_v2, 0.0  ;;  %v734_v5 = vmul.f32 0.2, %v613_v2  ;;  %v698_v6 = vadd.f32 %v697_v59, %v657_v4  ;;  %v700_v7 = vpop.f32.mrf.mxu1 }
 0x19f   :  { %v750_v8 = vsel %vm718_vm3, %v613_v2, %v734_v5  ;;  %vm721_vm4 = vcmp.ge.f32.partialorder %v698_v6, 0.0  ;;  %v737_v9 = vmul.f32 0.2, %v698_v6 }
 0x1a0   :  { %766 = vst [vmem:[#allocation2] sm:$0xff] %v750_v8  ;;  %v574_v10 = vpop.f32.mrf.mxu2 }
 0x1a1   :  { %v753_v11 = vsel %vm721_vm4, %v698_v6, %v737_v9  ;;  %v575_v12 = vadd.f32 %v574_v10, %v1390_v60 }
 0x1a2   :  { %770 = vst.msk [vmem:[#allocation2 + $0x18] sm:$0xff] %vm767_vm2, %v753_v11  ;;  %v659_v13 = vpop.f32.mrf.mxu0 }
 0x1a3   :  { %v616_v14 = vadd.f32 %v615_v3, %v575_v12  ;;  %v618_v17 = vpop.f32.mrf.mxu3  ;;  %v660_v18 = vadd.f32 %v659_v13, %v1387_v55 }
 0x1a5   :  { %vm720_vm5 = vcmp.ge.f32.partialorder %v616_v14, 0.0  ;;  %v736_v19 = vmul.f32 0.2, %v616_v14  ;;  %v701_v21 = vadd.f32 %v700_v7, %v660_v18  ;;  %v703_v22 = vpop.f32.mrf.mxu1 }
 0x1a7   :  { %v752_v23 = vsel %vm720_vm5, %v616_v14, %v736_v19  ;;  %vm723_vm6 = vcmp.ge.f32.partialorder %v701_v21, 0.0  ;;  %v739_v25 = vmul.f32 0.2, %v701_v21 }
 0x1a8   :  { %769 = vst [vmem:[#allocation2 + $0x10] sm:$0xff] %v752_v23  ;;  %v577_v26 = vpop.f32.mrf.mxu2 }
 0x1a9   :  { %v755_v27 = vsel %vm723_vm6, %v701_v21, %v739_v25  ;;  %v578_v28 = vadd.f32 %v577_v26, %v1390_v60 }
 0x1aa   :  { %772 = vst.msk [vmem:[#allocation2 + $0x28] sm:$0xff] %vm767_vm2, %v755_v27  ;;  %v662_v29 = vpop.f32.mrf.mxu0 }
 0x1ab   :  { %v619_v30 = vadd.f32 %v618_v17, %v578_v28  ;;  %v621_v31 = vpop.f32.mrf.mxu3  ;;  %v663_v32 = vadd.f32 %v662_v29, %v1387_v55 }
 0x1ad   :  { %vm722_vm7 = vcmp.ge.f32.partialorder %v619_v30, 0.0  ;;  %v738_v33 = vmul.f32 0.2, %v619_v30  ;;  %v704_v34 = vadd.f32 %v703_v22, %v663_v32  ;;  %v706_v35 = vpop.f32.mrf.mxu1 }
 0x1af   :  { %v754_v36 = vsel %vm722_vm7, %v619_v30, %v738_v33  ;;  %vm725_vm8 = vcmp.ge.f32.partialorder %v704_v34, 0.0  ;;  %v741_v37 = vmul.f32 0.2, %v704_v34 }
 0x1b0   :  { %771 = vst [vmem:[#allocation2 + $0x20] sm:$0xff] %v754_v36  ;;  %v580_v38 = vpop.f32.mrf.mxu2 }
 0x1b1   :  { %v757_v39 = vsel %vm725_vm8, %v704_v34, %v741_v37  ;;  %v581_v40 = vadd.f32 %v580_v38, %v1390_v60 }
 0x1b2   :  { %774 = vst.msk [vmem:[#allocation2 + $0x38] sm:$0xff] %vm767_vm2, %v757_v39  ;;  %v665_v41 = vpop.f32.mrf.mxu0 }
 0x1b3   :  { %v622_v42 = vadd.f32 %v621_v31, %v581_v40  ;;  %v666_v43 = vadd.f32 %v665_v41, %v1387_v55  ;;  %v624_v44 = vpop.f32.mrf.mxu3 }
 0x1b5   :  { %vm724_vm9 = vcmp.ge.f32.partialorder %v622_v42, 0.0  ;;  %v740_v45 = vmul.f32 0.2, %v622_v42  ;;  %v707_v46 = vadd.f32 %v706_v35, %v666_v43  ;;  %v709_v49 = vpop.f32.mrf.mxu1 }
 0x1b7   :  { %v756_v47 = vsel %vm724_vm9, %v622_v42, %v740_v45  ;;  %vm727_vm10 = vcmp.ge.f32.partialorder %v707_v46, 0.0  ;;  %v743_v48 = vmul.f32 0.2, %v707_v46 }
 0x1b8   :  { %773 = vst [vmem:[#allocation2 + $0x30] sm:$0xff] %v756_v47  ;;  %v583_v50 = vpop.f32.mrf.mxu2 }
 0x1b9   :  { %v759_v51 = vsel %vm727_vm10, %v707_v46, %v743_v48  ;;  %v584_v16 = vadd.f32 %v583_v50, %v1390_v60 }
 0x1ba   :  { %776 = vst.msk [vmem:[#allocation2 + $0x48] sm:$0xff] %vm767_vm2, %v759_v51  ;;  %v668_v15 = vpop.f32.mrf.mxu0 }
 0x1bb   :  { %v625_v52 = vadd.f32 %v624_v44, %v584_v16  ;;  %v669_v20 = vadd.f32 %v668_v15, %v1387_v55  ;;  %v627_v56 = vpop.f32.mrf.mxu3 }
 0x1bd   :  { %vm726_vm11 = vcmp.ge.f32.partialorder %v625_v52, 0.0  ;;  %v742_v53 = vmul.f32 0.2, %v625_v52  ;;  %v710_v54 = vadd.f32 %v709_v49, %v669_v20  ;;  %v712_v62 = vpop.f32.mrf.mxu1 }
 0x1bf   :  { %v758_v57 = vsel %vm726_vm11, %v625_v52, %v742_v53  ;;  %vm729_vm12 = vcmp.ge.f32.partialorder %v710_v54, 0.0  ;;  %v745_v24 = vmul.f32 0.2, %v710_v54 }
 0x1c0   :  { %775 = vst [vmem:[#allocation2 + $0x40] sm:$0xff] %v758_v57  ;;  %v586_v58 = vpop.f32.mrf.mxu2 }
 0x1c1   :  { %v761_v59 = vsel %vm729_vm12, %v710_v54, %v745_v24  ;;  %v587_v61 = vadd.f32 %v586_v58, %v1390_v60 }
 0x1c2   :  { %778 = vst.msk [vmem:[#allocation2 + $0x58] sm:$0xff] %vm767_vm2, %v761_v59  ;;  %v671_v63 = vpop.f32.mrf.mxu0 }
 0x1c3   :  { %v628_v0 = vadd.f32 %v627_v56, %v587_v61  ;;  %v672_v1 = vadd.f32 %v671_v63, %v1387_v55  ;;  %v630_v6 = vpop.f32.mrf.mxu3 }
 0x1c5   :  { %vm728_vm13 = vcmp.ge.f32.partialorder %v628_v0, 0.0  ;;  %v744_v2 = vmul.f32 0.2, %v628_v0  ;;  %v713_v3 = vadd.f32 %v712_v62, %v672_v1  ;;  %v715_v13 = vpop.f32.mrf.mxu1 }
 0x1c7   :  { %v760_v4 = vsel %vm728_vm13, %v628_v0, %v744_v2  ;;  %vm731_vm14 = vcmp.ge.f32.partialorder %v713_v3, 0.0  ;;  %v747_v5 = vmul.f32 0.2, %v713_v3 }
 0x1c8   :  { %777 = vst [vmem:[#allocation2 + $0x50] sm:$0xff] %v760_v4  ;;  %v589_v7 = vpop.f32.mrf.mxu2 }
 0x1c9   :  { %v763_v8 = vsel %vm731_vm14, %v713_v3, %v747_v5  ;;  %v590_v9 = vadd.f32 %v589_v7, %v1390_v60 }
 0x1ca   :  { %780 = vst.msk [vmem:[#allocation2 + $0x68] sm:$0xff] %vm767_vm2, %v763_v8  ;;  %v674_v10 = vpop.f32.mrf.mxu0 }
 0x1cb   :  { %v631_v11 = vadd.f32 %v630_v6, %v590_v9  ;;  %v675_v12 = vadd.f32 %v674_v10, %v1387_v55  ;;  %v633_v25 = vpop.f32.mrf.mxu3 }
 0x1cd   :  { %vm730_vm15 = vcmp.ge.f32.partialorder %v631_v11, 0.0  ;;  %v746_v14 = vmul.f32 0.2, %v631_v11  ;;  %v716_v17 = vadd.f32 %v715_v13, %v675_v12 }
 0x1cf   :  { %v762_v18 = vsel %vm730_vm15, %v631_v11, %v746_v14  ;;  %vm733_vm0 = vcmp.ge.f32.partialorder %v716_v17, 0.0  ;;  %v749_v19 = vmul.f32 0.2, %v716_v17 }
 0x1d0   :  { %779 = vst [vmem:[#allocation2 + $0x60] sm:$0xff] %v762_v18  ;;  %v592_v21 = vpop.f32.mrf.mxu2 }
 0x1d1   :  { %v765_v22 = vsel %vm733_vm0, %v716_v17, %v749_v19  ;;  %v593_v23 = vadd.f32 %v592_v21, %v1390_v60 }
 0x1d2   :  { %782 = vst.msk [vmem:[#allocation2 + $0x78] sm:$0xff] %vm767_vm2, %v765_v22 }
 0x1d3   :  { %v634_v55 = vadd.f32 %v633_v25, %v593_v23 }
 0x1d5   :  { %vm732_vm1 = vcmp.ge.f32.partialorder %v634_v55, 0.0  ;;  %v748_v26 = vmul.f32 0.2, %v634_v55 }
 0x1d7   :  { %v764_v27 = vsel %vm732_vm1, %v634_v55, %v748_v26 }
 0x1d8   :  { %781 = vst [vmem:[#allocation2 + $0x70] sm:$0xff] %v764_v27 }
 0x1d9   :  { %795 = dma.vmem_to_hbm [thread:$0]  %s788_s8, 2048, %s790_s0, [#allocation3], %s853_s11, %s853_s11, %s854_s2  }
 0x1da   :  { %850 = dma.done.wait [#allocation3], 2048  }
 0x1db   :  { %851 = vsyncadd [#allocation3], 4294965248 }
 0x1dc   :  { %800 = vsyncpa [#allocation3], 1 }

</bundles_post_ra>
